<compile_context>
chip_gen: v5e
topology: v5e:2x2
jax: 0.10.0
libtpu: 0.0.40
codegen_flags: <defaults>
</compile_context>

<pallas_src>
import functools

import jax
import jax.numpy as jnp
from jax.experimental import pallas as pl
from jax.experimental.pallas import tpu as pltpu


def _round_up(n, m):
    return ((n + m - 1) // m) * m


# --------------------------------------------------------------------------- #
# Kernel: one batch tile of relu(relu(x @ W1 + b1) @ W2 + b2)
# --------------------------------------------------------------------------- #
def classifier_kernel(x_ref, w1_ref, b1_ref, w2_ref, b2_ref, o_ref):
    # First linear + ReLU: MXU matmul with f32 accumulation, f32 epilogue.
    h = jnp.dot(x_ref[...], w1_ref[...], preferred_element_type=jnp.float32)
    h = jnp.maximum(h + b1_ref[...], 0.0)                  # b1 is f32
    # Second linear + ReLU. Cast h to the weight dtype (no-op for f32 weights,
    # bf16 on the bf16 path) so the MXU sees matching operands; accumulate f32.
    p = jnp.dot(h.astype(w2_ref.dtype), w2_ref[...],
                preferred_element_type=jnp.float32)
    p = jnp.maximum(p + b2_ref[...], 0.0)                  # b2 is f32
    # Single cast on store (epilogue stays f32 -> fine on v5e's non-bf16 VPU).
    o_ref[...] = p.astype(o_ref.dtype)


# --------------------------------------------------------------------------- #
# One-time parameter preparation (hoisted out of the per-call path).
# --------------------------------------------------------------------------- #
def prepare_classifier_params(w1, b1, w2, b2, compute_dtype=jnp.bfloat16):
    """Cast weights once to the MXU operand dtype and biases to f32 row vectors.

    w1: [feat_in, hidden]      (transposed vs. nn.Linear.weight)
    b1: [hidden]
    w2: [hidden, num_classes]  (transposed vs. nn.Linear.weight)
    b2: [num_classes]
    compute_dtype: matmul-operand dtype (bf16 default; None -> keep f32).
    """
    wdt = jnp.float32 if compute_dtype is None else compute_dtype
    w1 = jnp.asarray(w1).astype(wdt)
    w2 = jnp.asarray(w2).astype(wdt)
    b1 = jnp.asarray(b1).reshape(1, -1).astype(jnp.float32)
    b2 = jnp.asarray(b2).reshape(1, -1).astype(jnp.float32)
    return w1, b1, w2, b2


def _invariant_spec(shape):
    """Grid-invariant operand: request a single VMEM buffer (no double-buffer)."""
    idx = lambda i: (0, 0)
    if hasattr(pl, "Buffered"):
        try:
            return pl.BlockSpec(shape, idx, pipeline_mode=pl.Buffered(buffer_count=1))
        except TypeError:  # older Pallas without pipeline_mode kwarg
            pass
    return pl.BlockSpec(shape, idx)


# --------------------------------------------------------------------------- #
# Forward wrapper
# --------------------------------------------------------------------------- #
def classifier_forward(x, w1, b1, w2, b2, *, block_b=512, min_grid_steps=1,
                       vmem_budget_bytes=12 * 1024 * 1024,
                       xla_fastpath_elems=0):
    """Fused classifier forward.

    x : [B, feat_in]; (w1,b1,w2,b2) must come from `prepare_classifier_params`
    (weights possibly bf16, biases f32 row vectors). Returns [B, num_classes]
    in x.dtype.

    min_grid_steps: set to 2 on v7x so the 'parallel' batch axis shards across
    both TensorCores for moderate batch sizes.
    xla_fastpath_elems: if >0 and B*feat_in*hidden is below it, skip Pallas and
    let XLA fuse the tiny dot-relu-dot-relu (faster at the module's native
    shapes). Disabled by default so the kernel path is exercised.
    """
    B, feat_in = x.shape
    hidden = w1.shape[1]
    num_classes = w2.shape[1]
    assert w1.shape == (feat_in, hidden) and b1.shape == (1, hidden)
    assert w2.shape == (hidden, num_classes) and b2.shape == (1, num_classes)

    out_dtype = x.dtype
    compute_dtype = w1.dtype

    # Optional tiny-problem fast path (plain XLA fusion beats any custom kernel
    # at B=8, 64->32->16).
    if xla_fastpath_elems and B * feat_in * hidden <= xla_fastpath_elems:
        h = jnp.maximum(jnp.dot(x.astype(compute_dtype), w1,
                                preferred_element_type=jnp.float32) + b1, 0.0)
        p = jnp.maximum(jnp.dot(h.astype(compute_dtype), w2,
                                preferred_element_type=jnp.float32) + b2, 0.0)
        return p.astype(out_dtype)

    sz_in = jnp.dtype(compute_dtype).itemsize
    sz_out = jnp.dtype(out_dtype).itemsize
    sz_w = jnp.dtype(w1.dtype).itemsize

    # Sub-32-bit operands pack two rows per sublane -> use 16-row granularity.
    sub = 16 if sz_in < 4 else 8

    # Balanced batch tiles (avoid padding nearly a whole tile of zero rows).
    n_tiles = max(min_grid_steps, pl.cdiv(B, block_b))
    tb = _round_up(pl.cdiv(B, n_tiles), sub)
    tb = min(tb, _round_up(B, sub))           # never larger than one padded batch

    # Explicit VMEM budget: double-buffered x/out tiles + single-buffered weights.
    weight_bytes = ((feat_in * hidden + hidden * num_classes) * sz_w
                    + (hidden + num_classes) * 4)
    per_row = 2 * feat_in * sz_in + 2 * num_classes * sz_out
    avail = max(0, vmem_budget_bytes - weight_bytes)
    max_tb = max(sub, (avail // per_row) // sub * sub)
    tb = min(tb, max_tb)

    Bp = _round_up(B, tb)
    grid = (Bp // tb,)

    # Per-call work on x only: cast to the matmul operand dtype, pad batch rows.
    xc = x if x.dtype == compute_dtype else x.astype(compute_dtype)
    if Bp != B:
        # NOTE: padded rows produce relu(b1)-derived garbage; they are sliced
        # off below and must never be consumed directly.
        xc = jnp.pad(xc, ((0, Bp - B), (0, 0)))

    # Cost estimate on *real* dims (advisory for XLA's scheduler).
    cost = pl.CostEstimate(
        flops=2 * B * (feat_in * hidden + hidden * num_classes),
        transcendentals=0,
        bytes_accessed=int(B * feat_in * sz_in + weight_bytes
                           + B * num_classes * sz_out),
    )

    compiler_kwargs = dict(dimension_semantics=("parallel",))
    if vmem_budget_bytes > 16 * 1024 * 1024:
        # Only raise the scoped-VMEM limit when a caller asks for a big budget
        # (default budget fits under every generation's default limit).
        compiler_kwargs["vmem_limit_bytes"] = int(vmem_budget_bytes)

    out_padded = pl.pallas_call(
        classifier_kernel,
        out_shape=jax.ShapeDtypeStruct((Bp, num_classes), out_dtype),
        grid=grid,
        in_specs=[
            pl.BlockSpec((tb, feat_in), lambda i: (i, 0)),   # streamed per tile
            _invariant_spec((feat_in, hidden)),              # resident weights
            _invariant_spec((1, hidden)),
            _invariant_spec((hidden, num_classes)),
            _invariant_spec((1, num_classes)),
        ],
        out_specs=pl.BlockSpec((tb, num_classes), lambda i: (i, 0)),
        compiler_params=pltpu.CompilerParams(**compiler_kwargs),
        cost_estimate=cost,
    )(xc, w1, b1, w2, b2)

    # Only slice when batch padding was actually added (no class padding at all).
    return out_padded if Bp == B else out_padded[:B]


if __name__ == "__main__":
    # Small shapes consistent with the module:
    #   feat_in=64, args.num_hidden_act=32, num_classes=16, batch=8
    batch, feat_in, hidden, num_classes = 8, 64, 32, 16

    key = jax.random.PRNGKey(0)
    kx, kw1, kb1, kw2, kb2 = jax.random.split(key, 5)

    x = jax.random.normal(kx, (batch, feat_in), dtype=jnp.float32)
    # Deterministic synthetic parameters (nn.Linear-like scale), stored
    # transposed vs. nn.Linear.weight ([in, out]) with 1-D biases.
    w1 = jax.random.normal(kw1, (feat_in, hidden), dtype=jnp.float32) * feat_in ** -0.5
    b1 = jax.random.normal(kb1, (hidden,), dtype=jnp.float32) * 0.01
    w2 = jax.random.normal(kw2, (hidden, num_classes), dtype=jnp.float32) * hidden ** -0.5
    b2 = jax.random.normal(kb2, (num_classes,), dtype=jnp.float32) * 0.01

    # Pure-JAX reference.
    ref = jnp.maximum(jnp.maximum(x @ w1 + b1[None, :], 0.0) @ w2 + b2[None, :], 0.0)

    fwd = jax.jit(classifier_forward)

    # f32 path -> tight tolerance.
    params_f32 = prepare_classifier_params(w1, b1, w2, b2, compute_dtype=None)
    out_f32 = jax.block_until_ready(fwd(x, *params_f32))
    assert out_f32.shape == (batch, num_classes)
    assert jnp.allclose(out_f32, ref, atol=1e-5, rtol=1e-5)

    # Default bf16-operand path (f32 accumulate/epilogue) -> looser tolerance.
    params_bf16 = prepare_classifier_params(w1, b1, w2, b2)  # bf16 default
    out_bf16 = jax.block_until_ready(fwd(x, *params_bf16))
    assert out_bf16.shape == (batch, num_classes)
    assert jnp.allclose(out_bf16, ref, atol=5e-2, rtol=5e-2)

    print("KERNEL_OK")
</pallas_src>

<mosaic_0001>
module attributes {stable_mosaic.version = 11 : i64} {
  func.func @classifier_kernel(%arg0: i32, %arg1: memref<8x64xf32, #tpu.memory_space<vmem>>, %arg2: memref<64x32xf32, #tpu.memory_space<vmem>>, %arg3: memref<1x32xf32, #tpu.memory_space<vmem>>, %arg4: memref<32x16xf32, #tpu.memory_space<vmem>>, %arg5: memref<1x16xf32, #tpu.memory_space<vmem>>, %arg6: memref<8x16xf32, #tpu.memory_space<vmem>>) attributes {dimension_semantics = [#tpu.dimension_semantics<parallel>], iteration_bounds = array<i64: 1>, scalar_prefetch = 0 : i64, scratch_operands = 0 : i64, tpu.core_type = #tpu.core_type<tc>, window_params = [{transform_indices = @transform_0, window_bounds = array<i64: 8, 64>}, {pipeline_mode = #tpu.pipeline_mode<synchronous>, transform_indices = @transform_1, window_bounds = array<i64: 64, 32>}, {pipeline_mode = #tpu.pipeline_mode<synchronous>, transform_indices = @transform_2, window_bounds = array<i64: 1, 32>}, {pipeline_mode = #tpu.pipeline_mode<synchronous>, transform_indices = @transform_3, window_bounds = array<i64: 32, 16>}, {pipeline_mode = #tpu.pipeline_mode<synchronous>, transform_indices = @transform_4, window_bounds = array<i64: 1, 16>}, {transform_indices = @transform_5, window_bounds = array<i64: 8, 16>}]} {
    %c0 = arith.constant 0 : index
    %c0_0 = arith.constant 0 : index
    %0 = vector.load %arg1[%c0, %c0_0] : memref<8x64xf32, #tpu.memory_space<vmem>>, vector<8x64xf32>
    %c0_1 = arith.constant 0 : index
    %c0_2 = arith.constant 0 : index
    %1 = vector.load %arg2[%c0_1, %c0_2] : memref<64x32xf32, #tpu.memory_space<vmem>>, vector<64x32xf32>
    %cst = arith.constant dense<0.000000e+00> : vector<8x32xf32>
    %2 = tpu.matmul %0, %1, %cst {dimension_numbers = #tpu.dot_dimension_numbers<[1], [0], [0], [1], [0, 0, 1, 1], [], []>} : vector<8x64xf32>, vector<64x32xf32>, vector<8x32xf32> -> vector<8x32xf32>
    %c0_3 = arith.constant 0 : index
    %c0_4 = arith.constant 0 : index
    %3 = vector.load %arg3[%c0_3, %c0_4] : memref<1x32xf32, #tpu.memory_space<vmem>>, vector<1x32xf32>
    %4 = vector.broadcast %3 : vector<1x32xf32> to vector<8x32xf32>
    %5 = arith.addf %2, %4 : vector<8x32xf32>
    %cst_5 = arith.constant 0.000000e+00 : f32
    %6 = vector.broadcast %cst_5 : f32 to vector<8x32xf32>
    %7 = arith.maximumf %5, %6 : vector<8x32xf32>
    %c0_6 = arith.constant 0 : index
    %c0_7 = arith.constant 0 : index
    %8 = vector.load %arg4[%c0_6, %c0_7] : memref<32x16xf32, #tpu.memory_space<vmem>>, vector<32x16xf32>
    %cst_8 = arith.constant dense<0.000000e+00> : vector<8x16xf32>
    %9 = tpu.matmul %7, %8, %cst_8 {dimension_numbers = #tpu.dot_dimension_numbers<[1], [0], [0], [1], [0, 0, 1, 1], [], []>} : vector<8x32xf32>, vector<32x16xf32>, vector<8x16xf32> -> vector<8x16xf32>
    %c0_9 = arith.constant 0 : index
    %c0_10 = arith.constant 0 : index
    %10 = vector.load %arg5[%c0_9, %c0_10] : memref<1x16xf32, #tpu.memory_space<vmem>>, vector<1x16xf32>
    %11 = vector.broadcast %10 : vector<1x16xf32> to vector<8x16xf32>
    %12 = arith.addf %9, %11 : vector<8x16xf32>
    %cst_11 = arith.constant 0.000000e+00 : f32
    %13 = vector.broadcast %cst_11 : f32 to vector<8x16xf32>
    %14 = arith.maximumf %12, %13 : vector<8x16xf32>
    %c0_12 = arith.constant 0 : index
    %c0_13 = arith.constant 0 : index
    %15 = vector.load %arg6[%c0_12, %c0_13] : memref<8x16xf32, #tpu.memory_space<vmem>>, vector<8x16xf32>
    tpu.vector_store %arg6[%c0_12, %c0_13], %14 {strides = array<i32>} : memref<8x16xf32, #tpu.memory_space<vmem>>, vector<8x16xf32>,
    return
  }
  func.func @transform_0(%arg0: i32) -> (i32, i32) {
    %c0_i32 = arith.constant 0 : i32
    %c0_i32_0 = arith.constant 0 : i32
    return %arg0, %c0_i32 : i32, i32
  }
  func.func @transform_1(%arg0: i32) -> (i32, i32) {
    %c0_i32 = arith.constant 0 : i32
    %c0_i32_0 = arith.constant 0 : i32
    %c0_i32_1 = arith.constant 0 : i32
    return %c0_i32, %c0_i32_0 : i32, i32
  }
  func.func @transform_2(%arg0: i32) -> (i32, i32) {
    %c0_i32 = arith.constant 0 : i32
    %c0_i32_0 = arith.constant 0 : i32
    %c0_i32_1 = arith.constant 0 : i32
    return %c0_i32, %c0_i32_0 : i32, i32
  }
  func.func @transform_3(%arg0: i32) -> (i32, i32) {
    %c0_i32 = arith.constant 0 : i32
    %c0_i32_0 = arith.constant 0 : i32
    %c0_i32_1 = arith.constant 0 : i32
    return %c0_i32, %c0_i32_0 : i32, i32
  }
  func.func @transform_4(%arg0: i32) -> (i32, i32) {
    %c0_i32 = arith.constant 0 : i32
    %c0_i32_0 = arith.constant 0 : i32
    %c0_i32_1 = arith.constant 0 : i32
    return %c0_i32, %c0_i32_0 : i32, i32
  }
  func.func @transform_5(%arg0: i32) -> (i32, i32) {
    %c0_i32 = arith.constant 0 : i32
    %c0_i32_0 = arith.constant 0 : i32
    return %arg0, %c0_i32 : i32, i32
  }
}

</mosaic_0001>

<bundles_post_ra>
// kernel: classifier_forward.1
= control target key start
LH: loop header
LB: loop body
LE: loop exit
PB: predicated region body
PF: predicated region fallthrough
CT: control target
= control target key end

     0   :  { %s220_s0 = inlined_call_operand.vmem [shape: f32[8,64], index: 0, kind: input, shape index: {}]   ;;  %s221_s1 = inlined_call_operand.vmem [shape: f32[64,32], index: 1, kind: input, shape index: {}]   ;;  %s222_s2 = inlined_call_operand.vmem [shape: f32[1,32], index: 2, kind: input, shape index: {}]   ;;  %s223_s3 = inlined_call_operand.vmem [shape: f32[32,16], index: 3, kind: input, shape index: {}]   ;;  %s224_s4 = inlined_call_operand.vmem [shape: f32[1,16], index: 4, kind: input, shape index: {}]   ;;  %s225_s5 = inlined_call_operand.hbm [shape: f32[8,16], index: 5, kind: output, shape index: {}]  }
   0x1   :  { %v29_v0 = vld [vmem:[%s221_s1 + $0x38] sm:$0xff]  ;;  %v28_v1 = vld [vmem:[%s221_s1 + $0x30] sm:$0xff]  ;;  %v27_v2 = vld [vmem:[%s221_s1 + $0x28] sm:$0xff] }
   0x2   :  { %46 = vmatpush.msra.mxu0 %v29_v0  ;;  %v62_v3 = vld [vmem:[%s223_s3 + $0x18] sm:$0xff]  ;;  %v26_v4 = vld [vmem:[%s221_s1 + $0x20] sm:$0xff] }
   0x3   :  { %83 = vmatpush.msra.mxu1 %v62_v3 }
   0x4   :  { %47 = vmatpush.msra.mxu0 %v28_v1 }
   0x5   :  { %10 = vsyncpa [#allocation3], 0  ;;  %v25_v5 = vld [vmem:[%s221_s1 + $0x18] sm:$0xff]  ;;  %v24_v6 = vld [vmem:[%s221_s1 + $0x10] sm:$0xff]  ;;  %vm34_vm0 = vcmask 523264   ;;  %vm67_vm1 = vcmask 261120  }
   0x6   :  { %48 = vmatpush.msra.mxu0 %v27_v2  ;;  %v23_v7 = vld [vmem:[%s221_s1 + $0x8] sm:$0xff]  ;;  %v22_v8 = vld [vmem:[%s221_s1] sm:$0xff]  ;;  %v61_v10 = vld [vmem:[%s223_s3 + $0x10] sm:$0xff]  ;;  %s141_s21 = smov [#allocation2]   ;;  %vm92_vm2 = vcmask 130048  }
   0x7   :  { %v21_v9 = vld [vmem:[%s220_s0] sm:$0xff]  ;;  %84 = vmatpush.msra.mxu1 %v61_v10  ;;  %v60_v11 = vld [vmem:[%s223_s3 + $0x8] sm:$0xff]  ;;  %s99_s22 = sshll.u32 %s141_s21, 4  ;;  %s100_s22 = int_to_ptr.vmem [resolvable:$true] %s99_s22 }
   0x8   :  { %49 = vmatpush.msra.mxu0 %v26_v4  ;;  %v59_v12 = vld [vmem:[%s223_s3] sm:$0xff]  ;;  %s101_s3 = sshll.u32 %s225_s5, 4  ;;  %s102_s3 = int_to_ptr.hbm [resolvable:$true] %s101_s3 }
   0x9   :  { %85 = vmatpush.msra.mxu1 %v60_v11  ;;  %v113_v13 = vld [vmem:[%s222_s2] ss:$0 sm:$0xff] }
   0xa   :  { %50 = vmatpush.msra.mxu0 %v25_v5  ;;  %v114_v17 = vld [vmem:[%s224_s4] ss:$0 sm:$0xff] }
   0xb   :  { %86 = vmatpush.msra.mxu1 %v59_v12 }
   0xc   :  { %51 = vmatpush.msra.mxu0 %v24_v6 }
   0xe   :  { %52 = vmatpush.msra.mxu0 %v23_v7 }
  0x10   :  { %53 = vmatpush.msra.mxu0 %v22_v8 }
  0x11   :  { %110 = vmatmul.msk.f32.vlgmr.msra.gmra.mxu0 %vm34_vm0, %v21_v9 }
  0x8e   :  { %v55_v14 = vpop.f32.mrf.mxu0 }
  0x8f   :  { %v56_v15 = vadd.f32 %v113_v13, %v55_v14 }
  0x91   :  { %v58_v16 = vmax.f32 %v56_v15, 0.0 }
  0x93   :  { %111 = vmatmul.msk.f32.vlgmr.msra.gmra.mxu1 %vm67_vm1, %v58_v16 }
 0x110   :  { %v88_v18 = vpop.f32.mrf.mxu1 }
 0x111   :  { %v89_v19 = vadd.f32 %v114_v17, %v88_v18 }
 0x113   :  { %v91_v20 = vmax.f32 %v89_v19, 0.0 }
 0x115   :  { %93 = vst.msk [vmem:[#allocation2] sm:$0xff] %vm92_vm2, %v91_v20 }
 0x116   :  { %104 = dma.vmem_to_hbm [thread:$0]  %s100_s22, 128, %s102_s3, [#allocation3]  }
 0x117   :  { %139 = dma.done.wait [#allocation3], 128  }
 0x118   :  { %140 = vsyncadd [#allocation3], 4294967168 }
 0x119   :  { %109 = vsyncpa [#allocation3], 1 }

</bundles_post_ra>
